<compile_context>
chip_gen: v6e
topology: v6e:2x2x1
jax: 0.10.0
libtpu: 0.0.40
codegen_flags: <defaults>
</compile_context>

<pallas_src>
import numpy as np
import jax
import jax.numpy as jnp
from jax.experimental import pallas as pl
from jax.experimental.pallas import tpu as pltpu

PE_L = 5                        # positional-encoding bands
INPUT_T_DIM = 1 + 2 * PE_L      # 11, matches self.input_t_dim in the module
MIN_INDEX = 0.0
DEFAULT_TILE_N = 4096           # batch lanes per grid step (multiple of 128)
LANE = 128
OUT_ROWS = 8                    # padded output rows (real rows: 3)

CFG = {
    "pose": {
        # first in-dim / last out-dim get overridden (11 -> hidden ... -> 3),
        # exactly as define_network() does.
        "layers_feat": [None, 32, 32, 32, None],
        "skip": [2],
        "max_index": 16,
    }
}


def get_layer_dims(layers):
    return list(zip(layers[:-1], layers[1:]))


def _round_up(x, m):
    return ((x + m - 1) // m) * m


# -----------------------------------------------------------------------------
# Pallas kernel (specialised for layers_feat above: 4 linear layers, skip at 2)
# Transposed formulation: activations are (H, T) with the batch on lanes.
# -----------------------------------------------------------------------------
def make_kernel(max_index, hidden):
    H = hidden
    inv_half_range = 2.0 / (max_index - MIN_INDEX)
    # packed-slab row offsets (everything starts on an 8-row boundary)
    R_VEC, R_ENC, R_W1, R_W2F, R_W3 = 0, H, 3 * H, 4 * H, 5 * H

    def kernel(idx_ref, pk_ref, out_ref):
        # index normalization: 2*(i - min)/(max - min) - 1, as a (1, T) row
        x = (idx_ref[...] - MIN_INDEX) * inv_half_range - 1.0           # (1, T)

        # per-hidden-unit column vectors (H, 1): lanes of the vector block
        freq  = pk_ref[R_VEC:R_VEC + H, 0:1]
        phase = pk_ref[R_VEC:R_VEC + H, 1:2]
        w0x   = pk_ref[R_VEC:R_VEC + H, 2:3]
        b0    = pk_ref[R_VEC:R_VEC + H, 3:4]
        b1    = pk_ref[R_VEC:R_VEC + H, 4:5]
        w2x   = pk_ref[R_VEC:R_VEC + H, 5:6]
        b2    = pk_ref[R_VEC:R_VEC + H, 6:7]
        b3    = pk_ref[R_VEC:R_VEC + OUT_ROWS, 7:8]                     # (8, 1)
        w_enc = pk_ref[R_ENC:R_ENC + 2 * H, :]                          # (2H, H)
        w1    = pk_ref[R_W1:R_W1 + H, :]                                # (H, H)
        w2f   = pk_ref[R_W2F:R_W2F + H, :]                              # (H, H)
        w3    = pk_ref[R_W3:R_W3 + OUT_ROWS, :]                         # (8, H)

        # positional encoding, sin & cos in ONE transcendental pass:
        #   enc[k, :]   = sin(2^k*pi*x)         k = 0..4
        #   enc[5+k, :] = sin(2^k*pi*x + pi/2) = cos(2^k*pi*x)
        # rows >= 10 are sin(0) = 0 and the matching weight columns are zero.
        enc = jnp.sin(freq * x + phase)                                 # (H, T)

        # fused encoding matmul for layer 0 and the layer-2 skip branch:
        #   [W0e^T ; W2e^T] @ enc, split at the sublane-tile boundary H.
        enc2 = jnp.dot(w_enc, enc, preferred_element_type=jnp.float32)  # (2H, T)

        # layer 0: relu(W0^T @ [x; enc] + b0)  (x column kept as broadcast mul)
        h = jnp.maximum(enc2[:H] + w0x * x + b0, 0.0)                   # (H, T)

        # layer 1: relu(W1^T @ h + b1)
        h = jnp.maximum(
            jnp.dot(w1, h, preferred_element_type=jnp.float32) + b1, 0.0)

        # layer 2 (skip): relu(W2^T @ [h; x; enc] + b2), concat folded into splits
        h = jnp.maximum(
            jnp.dot(w2f, h, preferred_element_type=jnp.float32)
            + enc2[H:] + w2x * x + b2, 0.0)

        # output head: lane-dense unmasked (8, T) store; real rows are [:3]
        out_ref[...] = (jnp.dot(w3, h, preferred_element_type=jnp.float32)
                        + b3)

    return kernel


# -----------------------------------------------------------------------------
# Parameter init (deterministic, mirrors tensorflow_init_weights shapes/rules)
# -----------------------------------------------------------------------------
def init_params(key, cfg):
    layers = cfg["pose"]["layers_feat"]
    dims = get_layer_dims(layers)
    params = []
    for li, (k_in, k_out) in enumerate(dims):
        if li == 0:
            k_in = INPUT_T_DIM
        if li in cfg["pose"]["skip"]:
            k_in += INPUT_T_DIM
        if li == len(dims) - 1:
            k_out = 3
        key, wk = jax.random.split(key)
        if li == len(dims) - 1:
            # out='small': uniform(0, 1e-6)
            W = jax.random.uniform(wk, (k_in, k_out), jnp.float32, 0.0, 1e-6)
        else:
            # xavier_uniform (gain=1)
            limit = float(np.sqrt(6.0 / (k_in + k_out)))
            W = jax.random.uniform(wk, (k_in, k_out), jnp.float32, -limit, limit)
        b = jnp.zeros((k_out,), jnp.float32)
        params += [W, b]
    return tuple(params)


# -----------------------------------------------------------------------------
# Parameter packing: one resident (5H+8, H) slab, pre-transposed for lanes=batch
#   rows [0,   H)  : column vectors as lanes
#                    [freq, phase, w0x, b0, b1, w2x, b2, b3 (first 8 rows)]
#   rows [H,  3H)  : [W0_enc^T ; W2_enc^T]   (fused encoding matmul LHS)
#   rows [3H, 4H)  : W1^T
#   rows [4H, 5H)  : W2_feat^T
#   rows [5H, 5H+8): W3^T zero-padded to 8 output rows
# -----------------------------------------------------------------------------
def pack_params(params, hidden):
    H = hidden
    W0, b0, W1, b1, W2, b2, W3, b3 = params
    out_dim = W3.shape[1]
    assert H % 8 == 0 and H >= 2 * PE_L and H >= 8, "hidden must be >=10, 8-aligned"
    assert out_dim <= OUT_ROWS

    pi32 = np.float32(np.pi)
    base = (2.0 ** np.arange(PE_L, dtype=np.float32)) * pi32            # 2^k * pi
    freq = np.zeros((H,), np.float32)
    freq[:PE_L] = base
    freq[PE_L:2 * PE_L] = base
    phase = np.zeros((H,), np.float32)
    phase[PE_L:2 * PE_L] = np.float32(np.pi / 2.0)

    def col(v):
        return jnp.asarray(v, jnp.float32).reshape(H, 1)

    b3col = jnp.zeros((H, 1), jnp.float32).at[:out_dim, 0].set(b3)
    vec = jnp.concatenate(
        [col(freq), col(phase), col(W0[0]), col(b0),
         col(b1), col(W2[H]), col(b2), b3col], axis=1)                   # (H, 8)
    vec = jnp.pad(vec, ((0, 0), (0, H - 8)))                             # (H, H)

    def enc_t(block):                       # (2L, H) -> (H, H), zero-padded K
        t = jnp.asarray(block, jnp.float32).T                            # (H, 2L)
        return jnp.pad(t, ((0, 0), (0, H - 2 * PE_L)))

    w_enc = jnp.concatenate(
        [enc_t(W0[1:1 + 2 * PE_L]), enc_t(W2[H + 1:H + 1 + 2 * PE_L])],
        axis=0)                                                          # (2H, H)
    w3pad = jnp.zeros((OUT_ROWS, H), jnp.float32).at[:out_dim, :].set(W3.T)

    pk = jnp.concatenate([vec, w_enc, W1.T, W2[:H].T, w3pad], axis=0)    # (5H+8, H)
    return pk


# -----------------------------------------------------------------------------
# Wrapper: padding, packing, gridded pallas_call
# -----------------------------------------------------------------------------
def rotsnet_quad3_forward(index, params, cfg, tile_n=DEFAULT_TILE_N):
    max_index = float(cfg["pose"]["max_index"])
    idx = jnp.asarray(index, jnp.float32).reshape(1, -1)                 # (1, N)
    n = idx.shape[1]
    hidden = params[2].shape[0]                                          # W1: (H, H)
    out_dim = params[6].shape[1]                                         # W3: (H, 3)

    # batch tile along the lane axis: multiple of 128
    tile = max(LANE, _round_up(min(int(tile_n), n), LANE))
    n_pad_min = _round_up(n, LANE)
    if n_pad_min >= 2 * LANE:
        # keep >= 2 grid steps so both v7x TensorCores get work
        tile = min(tile, _round_up(pl.cdiv(n_pad_min, 2), LANE))
    n_pad = _round_up(n, tile)
    if n_pad != n:
        idx = jnp.pad(idx, ((0, 0), (0, n_pad - n)))

    pk = pack_params(params, hidden)

    out = pl.pallas_call(
        make_kernel(max_index, hidden),
        out_shape=jax.ShapeDtypeStruct((OUT_ROWS, n_pad), jnp.float32),
        grid=(n_pad // tile,),
        in_specs=[
            pl.BlockSpec((1, tile), lambda i: (0, i)),   # idx row: tiled over lanes
            pl.BlockSpec(pk.shape, lambda i: (0, 0)),    # params: resident
        ],
        out_specs=pl.BlockSpec((OUT_ROWS, tile), lambda i: (0, i)),
        compiler_params=pltpu.CompilerParams(
            dimension_semantics=("parallel",),
            vmem_limit_bytes=32 * 1024 * 1024),
    )(idx, pk)
    # (8, n_pad) -> (n, 3): tiny post-kernel slice/transpose
    return out[:out_dim, :n].T


# -----------------------------------------------------------------------------
# Pure-JAX reference (mirrors the torch forward exactly) for validation
# -----------------------------------------------------------------------------
def reference_forward(index, params, cfg):
    max_index = cfg["pose"]["max_index"]
    idx = jnp.asarray(index, jnp.float32).reshape(-1, 1)
    x = 2.0 * (idx - MIN_INDEX) / (max_index - MIN_INDEX) - 1.0
    freq = (2.0 ** jnp.arange(PE_L, dtype=jnp.float32)) * np.pi
    spec = x[..., None] * freq                                        # (N, 1, L)
    enc = jnp.stack([jnp.sin(spec), jnp.cos(spec)], axis=-2)          # (N, 1, 2, L)
    enc = enc.reshape(x.shape[0], -1)                                 # (N, 2L)
    points_enc = jnp.concatenate([x, enc], axis=-1)                   # (N, 11)

    W0, b0, W1, b1, W2, b2, W3, b3 = params
    ws = [(W0, b0), (W1, b1), (W2, b2), (W3, b3)]
    hp = jax.lax.Precision.HIGHEST
    feat = points_enc
    for li, (W, b) in enumerate(ws):
        if li in cfg["pose"]["skip"]:
            feat = jnp.concatenate([feat, points_enc], axis=-1)
        feat = jnp.dot(feat, W, precision=hp) + b
        if li != len(ws) - 1:
            feat = jnp.maximum(feat, 0.0)
    return feat


if __name__ == "__main__":
    key = jax.random.PRNGKey(0)
    pkey, ikey, fkey = jax.random.split(key, 3)

    params = init_params(pkey, CFG)

    # small test: forward() takes a list of camera/pose indices
    index = jax.random.randint(ikey, (16,), 0, CFG["pose"]["max_index"])
    out = jax.block_until_ready(rotsnet_quad3_forward(index, params, CFG))
    ref = reference_forward(index, params, CFG)
    np.testing.assert_allclose(np.asarray(out), np.asarray(ref),
                               rtol=1e-5, atol=1e-5)

    # exercise the multi-tile grid path (padding + parallel grid axis)
    index2 = jax.random.uniform(fkey, (300,), jnp.float32, 0.0,
                                float(CFG["pose"]["max_index"]))
    out2 = jax.block_until_ready(
        rotsnet_quad3_forward(index2, params, CFG, tile_n=256))
    ref2 = reference_forward(index2, params, CFG)
    np.testing.assert_allclose(np.asarray(out2), np.asarray(ref2),
                               rtol=1e-5, atol=1e-5)

    # stronger structural check: scale the tiny ('small'-init) output head up
    # so wiring/packing errors are not hidden by the ~1e-6 head weights
    params_big = list(params)
    params_big[6] = params[6] * 1e6
    params_big = tuple(params_big)
    out3 = jax.block_until_ready(
        rotsnet_quad3_forward(index2, params_big, CFG, tile_n=256))
    ref3 = reference_forward(index2, params_big, CFG)
    np.testing.assert_allclose(np.asarray(out3), np.asarray(ref3),
                               rtol=5e-3, atol=1e-3)

    print("KERNEL_OK")
</pallas_src>

<mosaic_0001>
module attributes {stable_mosaic.version = 11 : i64} {
  func.func @kernel(%arg0: i32, %arg1: memref<1x128xf32, #tpu.memory_space<vmem>>, %arg2: memref<168x32xf32, #tpu.memory_space<vmem>>, %arg3: memref<8x128xf32, #tpu.memory_space<vmem>>) attributes {dimension_semantics = [#tpu.dimension_semantics<parallel>], iteration_bounds = array<i64: 1>, scalar_prefetch = 0 : i64, scratch_operands = 0 : i64, tpu.core_type = #tpu.core_type<tc>, window_params = [{transform_indices = @transform_0, window_bounds = array<i64: 1, 128>}, {pipeline_mode = #tpu.pipeline_mode<synchronous>, transform_indices = @transform_1, window_bounds = array<i64: 168, 32>}, {transform_indices = @transform_2, window_bounds = array<i64: 8, 128>}]} {
    %c0 = arith.constant 0 : index
    %c0_0 = arith.constant 0 : index
    %0 = vector.load %arg1[%c0, %c0_0] : memref<1x128xf32, #tpu.memory_space<vmem>>, vector<1x128xf32>
    %cst = arith.constant 0.000000e+00 : f32
    %1 = vector.broadcast %cst : f32 to vector<1x128xf32>
    %2 = arith.subf %0, %1 : vector<1x128xf32>
    %cst_1 = arith.constant 1.250000e-01 : f32
    %3 = vector.broadcast %cst_1 : f32 to vector<1x128xf32>
    %4 = arith.mulf %2, %3 : vector<1x128xf32>
    %cst_2 = arith.constant 1.000000e+00 : f32
    %5 = vector.broadcast %cst_2 : f32 to vector<1x128xf32>
    %6 = arith.subf %4, %5 : vector<1x128xf32>
    %c0_3 = arith.constant 0 : index
    %c0_4 = arith.constant 0 : index
    %7 = vector.load %arg2[%c0_3, %c0_4] : memref<168x32xf32, #tpu.memory_space<vmem>>, vector<32x1xf32>
    %c0_5 = arith.constant 0 : index
    %c1 = arith.constant 1 : index
    %8 = vector.load %arg2[%c0_5, %c1] : memref<168x32xf32, #tpu.memory_space<vmem>>, vector<32x1xf32>
    %c0_6 = arith.constant 0 : index
    %c2 = arith.constant 2 : index
    %9 = vector.load %arg2[%c0_6, %c2] : memref<168x32xf32, #tpu.memory_space<vmem>>, vector<32x1xf32>
    %c0_7 = arith.constant 0 : index
    %c3 = arith.constant 3 : index
    %10 = vector.load %arg2[%c0_7, %c3] : memref<168x32xf32, #tpu.memory_space<vmem>>, vector<32x1xf32>
    %c0_8 = arith.constant 0 : index
    %c4 = arith.constant 4 : index
    %11 = vector.load %arg2[%c0_8, %c4] : memref<168x32xf32, #tpu.memory_space<vmem>>, vector<32x1xf32>
    %c0_9 = arith.constant 0 : index
    %c5 = arith.constant 5 : index
    %12 = vector.load %arg2[%c0_9, %c5] : memref<168x32xf32, #tpu.memory_space<vmem>>, vector<32x1xf32>
    %c0_10 = arith.constant 0 : index
    %c6 = arith.constant 6 : index
    %13 = vector.load %arg2[%c0_10, %c6] : memref<168x32xf32, #tpu.memory_space<vmem>>, vector<32x1xf32>
    %c0_11 = arith.constant 0 : index
    %c7 = arith.constant 7 : index
    %14 = vector.load %arg2[%c0_11, %c7] : memref<168x32xf32, #tpu.memory_space<vmem>>, vector<8x1xf32>
    %c32 = arith.constant 32 : index
    %c0_12 = arith.constant 0 : index
    %15 = vector.load %arg2[%c32, %c0_12] : memref<168x32xf32, #tpu.memory_space<vmem>>, vector<64x32xf32>
    %c96 = arith.constant 96 : index
    %c0_13 = arith.constant 0 : index
    %16 = vector.load %arg2[%c96, %c0_13] : memref<168x32xf32, #tpu.memory_space<vmem>>, vector<32x32xf32>
    %c128 = arith.constant 128 : index
    %c0_14 = arith.constant 0 : index
    %17 = vector.load %arg2[%c128, %c0_14] : memref<168x32xf32, #tpu.memory_space<vmem>>, vector<32x32xf32>
    %c160 = arith.constant 160 : index
    %c0_15 = arith.constant 0 : index
    %18 = vector.load %arg2[%c160, %c0_15] : memref<168x32xf32, #tpu.memory_space<vmem>>, vector<8x32xf32>
    %19 = vector.broadcast %7 : vector<32x1xf32> to vector<32x128xf32>
    %20 = vector.broadcast %6 : vector<1x128xf32> to vector<32x128xf32>
    %21 = arith.mulf %19, %20 : vector<32x128xf32>
    %22 = vector.broadcast %8 : vector<32x1xf32> to vector<32x128xf32>
    %23 = arith.addf %21, %22 : vector<32x128xf32>
    %24 = math.sin %23 : vector<32x128xf32>
    %cst_16 = arith.constant dense<0.000000e+00> : vector<64x128xf32>
    %25 = tpu.matmul %15, %24, %cst_16 {dimension_numbers = #tpu.dot_dimension_numbers<[1], [0], [0], [1], [0, 0, 1, 1], [], []>} : vector<64x32xf32>, vector<32x128xf32>, vector<64x128xf32> -> vector<64x128xf32>
    %26 = vector.extract_strided_slice %25 {offsets = [0, 0], sizes = [32, 128], strides = [1, 1]} : vector<64x128xf32> to vector<32x128xf32>
    %27 = vector.broadcast %9 : vector<32x1xf32> to vector<32x128xf32>
    %28 = vector.broadcast %6 : vector<1x128xf32> to vector<32x128xf32>
    %29 = arith.mulf %27, %28 : vector<32x128xf32>
    %30 = arith.addf %26, %29 : vector<32x128xf32>
    %31 = vector.broadcast %10 : vector<32x1xf32> to vector<32x128xf32>
    %32 = arith.addf %30, %31 : vector<32x128xf32>
    %cst_17 = arith.constant 0.000000e+00 : f32
    %33 = vector.broadcast %cst_17 : f32 to vector<32x128xf32>
    %34 = arith.maximumf %32, %33 : vector<32x128xf32>
    %cst_18 = arith.constant dense<0.000000e+00> : vector<32x128xf32>
    %35 = tpu.matmul %16, %34, %cst_18 {dimension_numbers = #tpu.dot_dimension_numbers<[1], [0], [0], [1], [0, 0, 1, 1], [], []>} : vector<32x32xf32>, vector<32x128xf32>, vector<32x128xf32> -> vector<32x128xf32>
    %36 = vector.broadcast %11 : vector<32x1xf32> to vector<32x128xf32>
    %37 = arith.addf %35, %36 : vector<32x128xf32>
    %cst_19 = arith.constant 0.000000e+00 : f32
    %38 = vector.broadcast %cst_19 : f32 to vector<32x128xf32>
    %39 = arith.maximumf %37, %38 : vector<32x128xf32>
    %cst_20 = arith.constant dense<0.000000e+00> : vector<32x128xf32>
    %40 = tpu.matmul %17, %39, %cst_20 {dimension_numbers = #tpu.dot_dimension_numbers<[1], [0], [0], [1], [0, 0, 1, 1], [], []>} : vector<32x32xf32>, vector<32x128xf32>, vector<32x128xf32> -> vector<32x128xf32>
    %41 = vector.extract_strided_slice %25 {offsets = [32, 0], sizes = [32, 128], strides = [1, 1]} : vector<64x128xf32> to vector<32x128xf32>
    %42 = arith.addf %40, %41 : vector<32x128xf32>
    %43 = vector.broadcast %12 : vector<32x1xf32> to vector<32x128xf32>
    %44 = vector.broadcast %6 : vector<1x128xf32> to vector<32x128xf32>
    %45 = arith.mulf %43, %44 : vector<32x128xf32>
    %46 = arith.addf %42, %45 : vector<32x128xf32>
    %47 = vector.broadcast %13 : vector<32x1xf32> to vector<32x128xf32>
    %48 = arith.addf %46, %47 : vector<32x128xf32>
    %cst_21 = arith.constant 0.000000e+00 : f32
    %49 = vector.broadcast %cst_21 : f32 to vector<32x128xf32>
    %50 = arith.maximumf %48, %49 : vector<32x128xf32>
    %cst_22 = arith.constant dense<0.000000e+00> : vector<8x128xf32>
    %51 = tpu.matmul %18, %50, %cst_22 {dimension_numbers = #tpu.dot_dimension_numbers<[1], [0], [0], [1], [0, 0, 1, 1], [], []>} : vector<8x32xf32>, vector<32x128xf32>, vector<8x128xf32> -> vector<8x128xf32>
    %52 = vector.broadcast %14 : vector<8x1xf32> to vector<8x128xf32>
    %53 = arith.addf %51, %52 : vector<8x128xf32>
    %c0_23 = arith.constant 0 : index
    %c0_24 = arith.constant 0 : index
    %54 = vector.load %arg3[%c0_23, %c0_24] : memref<8x128xf32, #tpu.memory_space<vmem>>, vector<8x128xf32>
    tpu.vector_store %arg3[%c0_23, %c0_24], %53 {strides = array<i32>} : memref<8x128xf32, #tpu.memory_space<vmem>>, vector<8x128xf32>,
    return
  }
  func.func @transform_0(%arg0: i32) -> (i32, i32) {
    %c0_i32 = arith.constant 0 : i32
    %c0_i32_0 = arith.constant 0 : i32
    return %c0_i32, %arg0 : i32, i32
  }
  func.func @transform_1(%arg0: i32) -> (i32, i32) {
    %c0_i32 = arith.constant 0 : i32
    %c0_i32_0 = arith.constant 0 : i32
    %c0_i32_1 = arith.constant 0 : i32
    return %c0_i32, %c0_i32_0 : i32, i32
  }
  func.func @transform_2(%arg0: i32) -> (i32, i32) {
    %c0_i32 = arith.constant 0 : i32
    %c0_i32_0 = arith.constant 0 : i32
    return %c0_i32, %arg0 : i32, i32
  }
}

</mosaic_0001>

<bundles_post_ra>
// kernel: tpu_custom_call.1
= control target key start
LH: loop header
LB: loop body
LE: loop exit
PB: predicated region body
PF: predicated region fallthrough
CT: control target
= control target key end

     0   :  { %v1251_v1 = vmov 1   ;;  %v1252_v2 = vmov 0   ;;  %s1708_s0 = inlined_call_operand.vmem [shape: f32[1,128], index: 0, kind: input, shape index: {}]   ;;  %s1709_s1 = inlined_call_operand.vmem [shape: f32[168,32], index: 1, kind: input, shape index: {}]   ;;  %s1710_s2 = inlined_call_operand.hbm [shape: f32[8,128], index: 2, kind: output, shape index: {}]  }
   0x1   :  { %v1286_v0 = vld [vmem:[%s1709_s1 + $0x18] sm:$0xff]  ;;  %1194 = vset.pattern.permute.xlu1 %v1251_v1  ;;  %1193 = vset.pattern.permute.xlu0 %v1252_v2 }
   0x2   :  { %7 = vsyncpa [#allocation3], 0  ;;  %79 = vperm.xlu1 %1194, %v1286_v0   ;;  %53 = vperm.xlu0 %1193, %v1286_v0   ;;  %v1293_v3 = vld [vmem:[%s1709_s1 + $0x10] sm:$0xff]  ;;  %v1298_v4 = vld [vmem:[%s1709_s1 + $0x8] sm:$0xff]  ;;  %v57_v6 = vlaneseq  ;;  %v1253_v57 = vmov 683565275  }
   0x3   :  { %v1305_v5 = vld [vmem:[%s1709_s1] sm:$0xff]  ;;  %v1254_v59 = vmov 2475754826   ;;  %v1255_v62 = vmov 2131351028   ;;  %s1267_s3 = smov [#allocation2]  }
   0x4   :  { %v12_v7 = vld [vmem:[%s1708_s0] sm:$0x1]  ;;  %v58_v8 = vshrl.u32 %v57_v6, 7  ;;  %v1257_v6 = vmov 920167782   ;;  %s1026_s4 = sshll.u32 %s1267_s3, 4  ;;  %s1027_s4 = int_to_ptr.vmem [resolvable:$true] %s1026_s4 }
   0x5   :  { %v13_v9 = vmul.f32 0.125, %v12_v7  ;;  %s1229_s5 = scalar_lea.vmem %s1027_s4, 128  ;;  %p1234_p1 = scmp.lt.s32.totalorder %s1027_s4, %s1027_s4 }
   0x6   :  { %1195 = vset.pattern.permute.xlu1 %v1252_v2  ;;  %48 = vperm.xlu0 %1193, %v1293_v3   ;;  %v59_v10 = vsub.s32 0, %v58_v8  ;;  %p1230_p0 = scmp.ne.s32.totalorder %s1027_s4, %s1229_s5  ;;  %p1235_p2 = scmp.lt.s32.totalorder %s1229_s5, %s1229_s5 }
   0x7   :  { %43 = vperm.xlu1 %1195, %v1298_v4   ;;  %v1034_v11 = vadd.f32 -1.0, %v13_v9 }
   0x8   :  { %p1236_p3 = por %p1235_p2, %p1234_p1 }
   0x9   :  { %v1314_v12 = vrot.slane %v1034_v11, %v59_v10 }
   0xa   :  { %1196 = vset.pattern.permute.xlu0 %v1251_v1  ;;  %p1237_p4 = pnand %p1236_p3, %p1230_p0 }
   0xb   :  { %75 = vperm.xlu0 %1196, %v1293_v3   ;;  %38 = vperm.xlu1 %1195, %v1305_v5  }
   0xf   :  { %67 = vperm.xlu0 %1196, %v1305_v5   ;;  %1197 = vset.pattern.permute.xlu1 %v1251_v1  ;;  %v1256_v1 = vmov 2102212464  }
  0x10   :  { %71 = vperm.xlu1 %1197, %v1298_v4  }
  0x7d   :  { %v80_v13 = vpop.permute.xlu1 %79  ;;  %v54_v14 = vpop.permute.xlu0 %53 }
  0x7e   :  { %v65_v15 = vmul.f32 %v1314_v12, %v54_v14  ;;  %v1258_v14 = vmov 1326507024  }
  0x80   :  { %v1317_v16 = vadd.f32 %v80_v13, %v65_v15 }
  0x81   :  { %v49_v17 = vpop.permute.xlu0 %48 }
  0x82   :  { %v401_v18 = vand.u32 2139095040, %v1317_v16  ;;  %v44_v19 = vpop.permute.xlu1 %43  ;;  %v64_v21 = vmul.f32 %v1314_v12, %v49_v17 }
  0x83   :  { %v63_v29 = vmul.f32 %v1314_v12, %v44_v19 }
  0x84   :  { %v402_v20 = vshrl.u32 %v401_v18, 23 }
  0x86   :  { %v76_v22 = vpop.permute.xlu0 %75  ;;  %v39_v23 = vpop.permute.xlu1 %38  ;;  %v1047_v24 = vadd.s32 4294967169, %v402_v20 }
  0x87   :  { %v1321_v25 = vadd.f32 %v76_v22, %v64_v21  ;;  %v62_v28 = vmul.f32 %v1314_v12, %v39_v23 }
  0x88   :  { %v408_v31 = vadd.s32 1, %v1047_v24 }
  0x89   :  { %v294_v26 = vand.u32 2147483647, %v1321_v25  ;;  %v297_v27 = vand.u32 2139095040, %v1321_v25 }
  0x8a   :  { %v68_v30 = vpop.permute.xlu0 %67  ;;  %vm409_vm0 = vcmp.gt.s32.totalorder %v408_v31, 0 }
  0x8b   :  { %v298_v32 = vshrl.u32 %v297_v27, 23  ;;  %v1327_v33 = vadd.f32 %v68_v30, %v62_v28  ;;  %v72_v34 = vpop.permute.xlu1 %71  ;;  %v301_v35 = vand.u32 8388607, %v294_v26  ;;  %v1339_v49 = vsel %vm409_vm0, %v408_v31, 0 }
  0x8c   :  { %v1331_v36 = vadd.f32 %v72_v34, %v63_v29 }
  0x8d   :  { %v1043_v37 = vadd.s32 4294967169, %v298_v32  ;;  %v86_v38 = vand.u32 2147483647, %v1327_v33  ;;  %v89_v39 = vand.u32 2139095040, %v1327_v33  ;;  %v302_v42 = vor.u32 8388608, %v301_v35 }
  0x8e   :  { %v193_v41 = vand.u32 2139095040, %v1331_v36  ;;  %v190_v45 = vand.u32 2147483647, %v1331_v36 }
  0x8f   :  { %v304_v40 = vadd.s32 1, %v1043_v37  ;;  %v90_v43 = vshrl.u32 %v89_v39, 23  ;;  %v93_v44 = vand.u32 8388607, %v86_v38  ;;  %v1341_v52 = vshll.u32 %v302_v42, 8 }
  0x90   :  { %v194_v46 = vshrl.u32 %v193_v41, 23  ;;  %v1345_v55 = vand.u32 8388607, %v190_v45 }
  0x91   :  { %vm305_vm1 = vcmp.gt.s32.totalorder %v304_v40, 0  ;;  %v1035_v48 = vadd.s32 4294967169, %v90_v43  ;;  %v94_v53 = vor.u32 8388608, %v93_v44 }
  0x92   :  { %v306_v47 = vsel %vm305_vm1, %v304_v40, 0  ;;  %v1039_v54 = vadd.s32 4294967169, %v194_v46 }
  0x93   :  { %v307_v50 = vshrl.u32 %v306_v47, 5  ;;  %v308_v51 = vand.u32 31, %v306_v47  ;;  %v96_v61 = vadd.s32 1, %v1035_v48  ;;  %v1367_v42 = vshll.u32 %v94_v53, 8 }
  0x94   :  { %v200_v43 = vadd.s32 1, %v1039_v54 }
  0x95   :  { %v309_v56 = vsub.s32 32, %v308_v51  ;;  %v311_v58 = vshll.u32 %v1253_v57, %v308_v51  ;;  %v314_v60 = vshll.u32 %v1254_v59, %v308_v51  ;;  %v317_v63 = vshll.u32 %v1255_v62, %v308_v51 }
  0x96   :  { %v320_v2 = vshll.u32 %v1256_v1, %v308_v51  ;;  %v323_v7 = vshll.u32 %v1257_v6, %v308_v51  ;;  %vm326_vm2 = vcmp.lt.s32.totalorder %v307_v50, 1  ;;  %vm327_vm3 = vcmp.lt.s32.totalorder %v307_v50, 2 }
  0x97   :  { %v312_v8 = vshrl.u32 %v1254_v59, %v309_v56  ;;  %v315_v9 = vshrl.u32 %v1255_v62, %v309_v56  ;;  %v318_v10 = vshrl.u32 %v1256_v1, %v309_v56  ;;  %v310_v11 = vshrl.u32 %v1253_v57, %v309_v56 }
  0x98   :  { %v321_v13 = vshrl.u32 %v1257_v6, %v309_v56  ;;  %v324_v15 = vshrl.u32 %v1258_v14, %v309_v56  ;;  %vm328_vm4 = vcmp.lt.s32.totalorder %v307_v50, 3  ;;  %vm97_vm5 = vcmp.gt.s32.totalorder %v96_v61, 0 }
  0x99   :  { %v313_v17 = vor.u32 %v312_v8, %v311_v58  ;;  %v316_v18 = vor.u32 %v315_v9, %v314_v60  ;;  %v319_v19 = vor.u32 %v318_v10, %v317_v63  ;;  %vm329_vm6 = vcmp.lt.s32.totalorder %v307_v50, 4 }
  0x9a   :  { %v322_v20 = vor.u32 %v321_v13, %v320_v2  ;;  %v325_v21 = vor.u32 %v324_v15, %v323_v7  ;;  %v98_v22 = vsel %vm97_vm5, %v96_v61, 0  ;;  %vm201_vm11 = vcmp.gt.s32.totalorder %v200_v43, 0 }
  0x9b   :  { %v330_v23 = vsel %vm326_vm2, %v310_v11, %v313_v17  ;;  %v331_v24 = vsel %vm329_vm6, %v319_v19, 2102212464  ;;  %v334_v27 = vsel %vm326_vm2, %v313_v17, %v316_v18  ;;  %v338_v28 = vsel %vm326_vm2, %v316_v18, %v319_v19 }
  0x9c   :  { %v332_v29 = vsel %vm328_vm4, %v316_v18, %v331_v24  ;;  %v335_v30 = vsel %vm329_vm6, %v322_v20, 920167782  ;;  %v339_v31 = vsel %vm329_vm6, %v325_v21, 1326507024  ;;  %v99_v32 = vshrl.u32 %v98_v22, 5 }
  0x9d   :  { %v333_v34 = vsel %vm327_vm3, %v330_v23, %v332_v29  ;;  %v336_v35 = vsel %vm328_vm4, %v319_v19, %v335_v30  ;;  %v340_v37 = vsel %vm328_vm4, %v322_v20, %v339_v31  ;;  %v100_v39 = vand.u32 31, %v98_v22 }
  0x9e   :  { %v337_v40 = vsel %vm327_vm3, %v334_v27, %v336_v35  ;;  %v341_v41 = vsel %vm327_vm3, %v338_v28, %v340_v37  ;;  %v349_v51 = vmul.u32 %v1341_v52, %v333_v34  ;;  %vm118_vm7 = vcmp.lt.s32.totalorder %v99_v32, 1 }
  0x9f   :  { %v1370_v44 = vmul.u32.u64.low %v1341_v52, %v341_v41  ;;  %v1371_v46 = vmul.u32.u64.high %v1341_v52, %v341_v41, %v1370_v44  ;;  %v1374_v47 = vmul.u32.u64.low %v1341_v52, %v337_v40  ;;  %v1375_v48 = vmul.u32.u64.high %v1341_v52, %v337_v40, %v1374_v47 }
  0xa0   :  { %v101_v56 = vsub.s32 32, %v100_v39  ;;  %v103_v58 = vshll.u32 %v1253_v57, %v100_v39  ;;  %v106_v50 = vshll.u32 %v1254_v59, %v100_v39  ;;  %v109_v53 = vshll.u32 %v1255_v62, %v100_v39 }
  0xa1   :  { %v112_v54 = vshll.u32 %v1256_v1, %v100_v39  ;;  %v115_v60 = vshll.u32 %v1257_v6, %v100_v39  ;;  %vm120_vm8 = vcmp.lt.s32.totalorder %v99_v32, 3  ;;  %vm351_vm9 = vc.u32 %v1371_v46, %v1374_v47 }
  0xa2   :  { %v104_v61 = vshrl.u32 %v1254_v59, %v101_v56  ;;  %v107_v63 = vshrl.u32 %v1255_v62, %v101_v56  ;;  %v110_v2 = vshrl.u32 %v1256_v1, %v101_v56  ;;  %v352_v52 = vadd.s32 1, %v1375_v48 }
  0xa3   :  { %v102_v7 = vshrl.u32 %v1253_v57, %v101_v56  ;;  %v113_v8 = vshrl.u32 %v1257_v6, %v101_v56  ;;  %v116_v13 = vshrl.u32 %v1258_v14, %v101_v56  ;;  %vm121_vm10 = vcmp.lt.s32.totalorder %v99_v32, 4 }
  0xa4   :  { %v105_v9 = vor.u32 %v104_v61, %v103_v58  ;;  %v108_v10 = vor.u32 %v107_v63, %v106_v50  ;;  %v111_v11 = vor.u32 %v110_v2, %v109_v53  ;;  %v353_v15 = vsel %vm351_vm9, %v352_v52, %v1375_v48 }
  0xa5   :  { %v114_v17 = vor.u32 %v113_v8, %v112_v54  ;;  %v354_v18 = vadd.s32 %v353_v15, %v349_v51  ;;  %v117_v19 = vor.u32 %v116_v13, %v115_v60  ;;  %vm119_vm12 = vcmp.lt.s32.totalorder %v99_v32, 2 }
  0xa6   :  { %v122_v20 = vsel %vm118_vm7, %v102_v7, %v105_v9  ;;  %v123_v21 = vsel %vm121_vm10, %v111_v11, 2102212464  ;;  %v126_v23 = vsel %vm118_vm7, %v105_v9, %v108_v10  ;;  %v130_v27 = vsel %vm118_vm7, %v108_v10, %v111_v11 }
  0xa7   :  { %v124_v22 = vsel %vm120_vm8, %v108_v10, %v123_v21  ;;  %v127_v24 = vsel %vm121_vm10, %v114_v17, 920167782  ;;  %v355_v28 = vadd.s32 536870912, %v354_v18  ;;  %v131_v30 = vsel %vm121_vm10, %v117_v19, 1326507024 }
  0xa8   :  { %v128_v29 = vsel %vm120_vm8, %v111_v11, %v127_v24  ;;  %v125_v31 = vsel %vm119_vm12, %v122_v20, %v124_v22  ;;  %v132_v35 = vsel %vm120_vm8, %v114_v17, %v131_v30  ;;  %v202_v37 = vsel %vm201_vm11, %v200_v43, 0 }
  0xa9   :  { %v129_v34 = vsel %vm119_vm12, %v126_v23, %v128_v29  ;;  %v1401_v39 = vshrl.u32 %v355_v28, 30  ;;  %v133_v40 = vsel %vm119_vm12, %v130_v27, %v132_v35  ;;  %v204_v56 = vand.u32 31, %v202_v37 }
  0xaa   :  { %v1404_v41 = vmul.u32.u64.low %v1367_v42, %v129_v34  ;;  %v1405_v44 = vmul.u32.u64.high %v1367_v42, %v129_v34, %v1404_v41  ;;  %v1409_v48 = vmul.u32.u64.low %v1367_v42, %v133_v40  ;;  %v1410_v51 = vmul.u32.u64.high %v1367_v42, %v133_v40, %v1409_v48 }
  0xab   :  { %v1413_v58 = vand.u32 31, %v1339_v49  ;;  %v357_v32 = vshll.u32 %v1401_v39, 30  ;;  %v398_v43 = vand.u32 2147483647, %v1317_v16  ;;  %v141_v50 = vmul.u32 %v1367_v42, %v125_v31 }
  0xac   :  { %v198_v53 = vor.u32 8388608, %v1345_v55  ;;  %v203_v54 = vshrl.u32 %v202_v37, 5  ;;  %v205_v60 = vsub.s32 32, %v204_v56  ;;  %v144_v61 = vadd.s32 1, %v1405_v44 }
  0xad   :  { %v207_v63 = vshll.u32 %v1253_v57, %v204_v56  ;;  %v210_v2 = vshll.u32 %v1254_v59, %v204_v56  ;;  %v213_v52 = vshll.u32 %v1255_v62, %v204_v56  ;;  %v1423_v7 = vsub.s32 %v354_v18, %v357_v32 }
  0xae   :  { %vm143_vm13 = vc.u32 %v1410_v51, %v1404_v41  ;;  %v208_v8 = vshrl.u32 %v1254_v59, %v205_v60  ;;  %v216_v42 = vshll.u32 %v1256_v1, %v204_v56  ;;  %v211_v9 = vshrl.u32 %v1255_v62, %v205_v60 }
  0xaf   :  { %v145_v55 = vsel %vm143_vm13, %v144_v61, %v1405_v44  ;;  %v214_v10 = vshrl.u32 %v1256_v1, %v205_v60  ;;  %v219_v11 = vshll.u32 %v1257_v6, %v204_v56  ;;  %v217_v17 = vshrl.u32 %v1257_v6, %v205_v60 }
  0xb0   :  { %v146_v13 = vadd.s32 %v145_v55, %v141_v50  ;;  %v209_v15 = vor.u32 %v208_v8, %v207_v63  ;;  %v220_v18 = vshrl.u32 %v1258_v14, %v205_v60  ;;  %v1436_v19 = vsub.s32 32, %v1413_v58 }
  0xb1   :  { %v212_v20 = vor.u32 %v211_v9, %v210_v2  ;;  %v215_v21 = vor.u32 %v214_v10, %v213_v52  ;;  %v1440_v22 = vand.u32 8388607, %v398_v43  ;;  %v360_v23 = vsub.s32 0, %v1423_v7 }
  0xb2   :  { %v147_v24 = vadd.s32 536870912, %v146_v13  ;;  %v218_v27 = vor.u32 %v217_v17, %v216_v42  ;;  %v221_v28 = vor.u32 %v220_v18, %v219_v11  ;;  %v206_v29 = vshrl.u32 %v1253_v57, %v205_v60 }
  0xb3   :  { %vm222_vm14 = vcmp.lt.s32.totalorder %v203_v54, 1  ;;  %vm225_vm15 = vcmp.lt.s32.totalorder %v203_v54, 4  ;;  %v238_v30 = vshll.u32 %v198_v53, 8  ;;  %vm224_vm0 = vcmp.lt.s32.totalorder %v203_v54, 3 }
  0xb4   :  { %v1444_v31 = vshrl.u32 %v147_v24, 30  ;;  %v230_v34 = vsel %vm222_vm14, %v209_v15, %v212_v20  ;;  %v231_v35 = vsel %vm225_vm15, %v218_v27, 920167782  ;;  %vm223_vm1 = vcmp.lt.s32.totalorder %v203_v54, 2 }
  0xb5   :  { %v227_v37 = vsel %vm225_vm15, %v215_v21, 2102212464  ;;  %v232_v40 = vsel %vm224_vm0, %v215_v21, %v231_v35  ;;  %v234_v44 = vsel %vm222_vm14, %v212_v20, %v215_v21  ;;  %v1044_v48 = vmin.u32 %v360_v23, %v1423_v7 }
  0xb6   :  { %v149_v56 = vshll.u32 %v1444_v31, 30  ;;  %v233_v32 = vsel %vm223_vm1, %v230_v34, %v232_v40  ;;  %v235_v50 = vsel %vm225_vm15, %v221_v28, 1326507024  ;;  %v415_v63 = vshll.u32 %v1253_v57, %v1413_v58 }
  0xb7   :  { %v236_v53 = vsel %vm224_vm0, %v218_v27, %v235_v50  ;;  %v1453_v60 = vmul.u32.u64.low %v238_v30, %v233_v32  ;;  %v1454_v61 = vmul.u32.u64.high %v238_v30, %v233_v32, %v1453_v60  ;;  %v226_v52 = vsel %vm222_vm14, %v206_v29, %v209_v15 }
  0xb8   :  { %v1459_v2 = vsub.s32 %v146_v13, %v149_v56  ;;  %v228_v8 = vsel %vm224_vm0, %v212_v20, %v227_v37  ;;  %v237_v42 = vsel %vm223_vm1, %v234_v44, %v236_v53  ;;  %v416_v55 = vshrl.u32 %v1254_v59, %v1436_v19 }
  0xb9   :  { %v418_v9 = vshll.u32 %v1254_v59, %v1413_v58  ;;  %v419_v10 = vshrl.u32 %v1255_v62, %v1436_v19  ;;  %v422_v11 = vshrl.u32 %v1256_v1, %v1436_v19  ;;  %v362_v13 = vclz %v1044_v48 }
  0xba   :  { %v152_v17 = vsub.s32 0, %v1459_v2  ;;  %v1473_v15 = vmul.u32.u64.low %v238_v30, %v237_v42  ;;  %v1474_v18 = vmul.u32.u64.high %v238_v30, %v237_v42, %v1473_v15  ;;  %v229_v20 = vsel %vm223_vm1, %v226_v52, %v228_v8 }
  0xbb   :  { %v248_v21 = vadd.s32 1, %v1454_v61  ;;  %v424_v23 = vshll.u32 %v1256_v1, %v1413_v58  ;;  %v425_v59 = vshrl.u32 %v1257_v6, %v1436_v19  ;;  %v411_v24 = vshrl.u32 %v1339_v49, 5 }
  0xbc   :  { %v1036_v27 = vmin.u32 %v152_v17, %v1459_v2  ;;  %v421_v28 = vshll.u32 %v1255_v62, %v1413_v58  ;;  %v417_v29 = vor.u32 %v416_v55, %v415_v63  ;;  %v420_v34 = vor.u32 %v419_v10, %v418_v9 }
  0xbd   :  { %v426_v35 = vor.u32 %v425_v59, %v424_v23  ;;  %v428_v54 = vshrl.u32 %v1258_v14, %v1436_v19  ;;  %v245_v37 = vmul.u32 %v238_v30, %v229_v20  ;;  %vm247_vm2 = vc.u32 %v1474_v18, %v1453_v60 }
  0xbe   :  { %v423_v1 = vor.u32 %v422_v11, %v421_v28  ;;  %v1045_v40 = vadd.s32 4294967294, %v362_v13  ;;  %v249_v44 = vsel %vm247_vm2, %v248_v21, %v1454_v61  ;;  %v406_v49 = vor.u32 8388608, %v1440_v22 }
  0xbf   :  { %v427_v48 = vshll.u32 %v1257_v6, %v1413_v58  ;;  %v154_v62 = vclz %v1036_v27  ;;  %v250_v56 = vadd.s32 %v249_v44, %v245_v37  ;;  %vm430_vm3 = vcmp.lt.s32.totalorder %v411_v24, 1 }
  0xc0   :  { %vm433_vm4 = vcmp.lt.s32.totalorder %v411_v24, 4  ;;  %vm432_vm5 = vcmp.lt.s32.totalorder %v411_v24, 3  ;;  %v438_v14 = vsel %vm430_vm3, %v417_v29, %v420_v34  ;;  %vm1046_vm6 = vcmp.lt.s32.totalorder %v1045_v40, 0 }
  0xc1   :  { %v429_v32 = vor.u32 %v428_v54, %v427_v48  ;;  %v439_v30 = vsel %vm433_vm4, %v426_v35, 920167782  ;;  %v251_v50 = vadd.s32 536870912, %v250_v56  ;;  %vm431_vm7 = vcmp.lt.s32.totalorder %v411_v24, 2 }
  0xc2   :  { %v440_v53 = vsel %vm432_vm5, %v423_v1, %v439_v30  ;;  %v414_v22 = vshrl.u32 %v1253_v57, %v1436_v19  ;;  %v435_v6 = vsel %vm433_vm4, %v423_v1, 2102212464  ;;  %v1037_v63 = vadd.s32 4294967294, %v154_v62 }
  0xc3   :  { %v1496_v61 = vshrl.u32 %v251_v50, 30  ;;  %v441_v58 = vsel %vm431_vm7, %v438_v14, %v440_v53  ;;  %v442_v52 = vsel %vm430_vm3, %v420_v34, %v423_v1  ;;  %v443_v8 = vsel %vm433_vm4, %v429_v32, 1326507024 }
  0xc4   :  { %v446_v42 = vshll.u32 %v406_v49, 8  ;;  %v365_v55 = vsel %vm1046_vm6, 0, %v1045_v40  ;;  %v434_v10 = vsel %vm430_vm3, %v414_v22, %v417_v29  ;;  %v444_v11 = vsel %vm432_vm5, %v426_v35, %v443_v8 }
  0xc5   :  { %v253_v9 = vshll.u32 %v1496_v61, 30  ;;  %v436_v13 = vsel %vm432_vm5, %v420_v34, %v435_v6  ;;  %v445_v17 = vsel %vm431_vm7, %v442_v52, %v444_v11  ;;  %v370_v20 = vsub.s32 4294967266, %v365_v55 }
  0xc6   :  { %v1507_v57 = vmul.u32.u64.low %v446_v42, %v441_v58  ;;  %v1508_v19 = vmul.u32.u64.high %v446_v42, %v441_v58, %v1507_v57  ;;  %vm1038_vm8 = vcmp.lt.s32.totalorder %v1037_v63, 0  ;;  %v437_v27 = vsel %vm431_vm7, %v434_v10, %v436_v13 }
  0xc7   :  { %v254_v15 = vsub.s32 %v250_v56, %v253_v9  ;;  %v1511_v21 = vmul.u32.u64.low %v446_v42, %v445_v17  ;;  %v1512_v23 = vmul.u32.u64.high %v446_v42, %v445_v17, %v1511_v21  ;;  %v157_v29 = vsel %vm1038_vm8, 0, %v1037_v63 }
  0xc8   :  { %v456_v28 = vadd.s32 1, %v1508_v19  ;;  %v371_v34 = vadd.s32 127, %v370_v20  ;;  %v453_v54 = vmul.u32 %v446_v42, %v437_v27  ;;  %v366_v37 = vsub.s32 32, %v365_v55 }
  0xc9   :  { %v256_v59 = vsub.s32 0, %v254_v15  ;;  %vm455_vm9 = vc.u32 %v1512_v23, %v1507_v57  ;;  %v162_v44 = vsub.s32 4294967266, %v157_v29  ;;  %v350_v48 = vadd.s32 %v1374_v47, %v1371_v46  ;;  %v19_v47 = vld [vmem:[%s1709_s1 + $0x20] sm:$0xff] }
  0xca   :  { %v457_v40 = vsel %vm455_vm9, %v456_v28, %v1508_v19  ;;  %v372_v62 = vshll.u32 %v371_v34, 23  ;;  %v367_v53 = vshll.u32 %v1423_v7, %v365_v55  ;;  %v246_v22 = vadd.s32 %v1453_v60, %v1474_v18 }
  0xcb   :  { %v1040_v35 = vmin.u32 %v256_v59, %v254_v15  ;;  %v458_v49 = vadd.s32 %v457_v40, %v453_v54  ;;  %v368_v32 = vshrl.u32 %v350_v48, %v366_v37  ;;  %v163_v14 = vadd.s32 127, %v162_v44 }
  0xcc   :  { %v373_v63 = vor.u32 4788187, %v372_v62  ;;  %v158_v52 = vsub.s32 32, %v157_v29  ;;  %v142_v42 = vadd.s32 %v1404_v41, %v1410_v51  ;;  %vm502_vm11 = vcmask 261120  }
  0xcd   :  { %v258_v1 = vclz %v1040_v35  ;;  %v459_v56 = vadd.s32 536870912, %v458_v49  ;;  %v369_v8 = vor.u32 %v368_v32, %v367_v53  ;;  %v164_v7 = vshll.u32 %v163_v14, 23  ;;  %1109 = vmatprep.mubr.msk.f32.mxu0 %vm502_vm11, %v19_v47 }
  0xce   :  { %v374_v18 = vand.u32 2147483647, %v373_v63  ;;  %v160_v13 = vshrl.u32 %v142_v42, %v158_v52  ;;  %v1259_v20 = vmov 2   ;;  %v159_v51 = vshll.u32 %v1459_v2, %v157_v29 }
  0xcf   :  { %v1041_v24 = vadd.s32 4294967294, %v258_v1  ;;  %v1521_v50 = vshrl.u32 %v459_v56, 30  ;;  %1198 = vset.pattern.permute.xlu1 %v1259_v20  ;;  %1199 = vset.pattern.permute.xlu0 %v1259_v20  ;;  %v376_v41 = vcvt.s32.f32 %v369_v8  ;;  %v454_v2 = vadd.s32 %v1507_v57, %v1512_v23 }
  0xd0   :  { %645 = vperm.xlu1 %1198, %v1286_v0   ;;  %641 = vperm.xlu0 %1199, %v1293_v3   ;;  %v161_v35 = vor.u32 %v160_v13, %v159_v51  ;;  %v1260_v48 = vmov 3   ;;  %vm296_vm13 = vcmp.lt.s32.totalorder %v1321_v25, 0  ;;  %vm192_vm14 = vcmp.lt.s32.totalorder %v1331_v36, 0 }
  0xd1   :  { %vm1042_vm10 = vcmp.lt.s32.totalorder %v1041_v24, 0  ;;  %v461_v46 = vshll.u32 %v1521_v50, 30  ;;  %v377_v28 = vmul.f32 %v376_v41, %v374_v18  ;;  %vm1548_vm15 = vcmp.le.f32.partialorder %v294_v26, 0.7853982 }
  0xd2   :  { %v261_v30 = vsel %vm1042_vm10, 0, %v1041_v24  ;;  %vm1560_vm0 = vcmp.le.f32.partialorder %v190_v45, 0.7853982  ;;  %vm88_vm1 = vcmp.lt.s32.totalorder %v1327_v33, 0  ;;  %v380_v45 = vsub.s32 4, %v1401_v39 }
  0xd3   :  { %v262_v6 = vsub.s32 32, %v261_v30  ;;  %v266_v58 = vsub.s32 4294967266, %v261_v30  ;;  %v263_v55 = vshll.u32 %v254_v15, %v261_v30  ;;  %v462_v11 = vsub.s32 %v458_v49, %v461_v46 }
  0xd4   :  { %v165_v15 = vor.u32 4788187, %v164_v7  ;;  %637 = vperm.xlu1 %1198, %v1298_v4   ;;  %633 = vperm.xlu0 %1199, %v1305_v5   ;;  %v378_v44 = vxor.u32 2147483648, %v377_v28  ;;  %v168_v49 = vcvt.s32.f32 %v161_v35  ;;  %vm1574_vm2 = vcmp.le.f32.partialorder %v86_v38, 0.7853982  ;;  %v20_v7 = vld [vmem:[%s1709_s1 + $0x28] sm:$0xff] }
  0xd5   :  { %v264_v9 = vshrl.u32 %v246_v22, %v262_v6  ;;  %v267_v10 = vadd.s32 127, %v266_v58  ;;  %v464_v19 = vsub.s32 0, %v462_v11  ;;  %v484_v18 = vsub.s32 4, %v1521_v50 }
  0xd6   :  { %v166_v37 = vand.u32 2147483647, %v165_v15  ;;  %v379_v14 = vsel %vm296_vm13, %v378_v44, %v377_v28  ;;  %vm400_vm3 = vcmp.lt.s32.totalorder %v1317_v16, 0  ;;  %vm1586_vm4 = vcmp.le.f32.partialorder %v398_v43, 0.7853982 }
  0xd7   :  { %v268_v60 = vshll.u32 %v267_v10, 23  ;;  %v265_v17 = vor.u32 %v264_v9, %v263_v55  ;;  %v1048_v59 = vmin.u32 %v464_v19, %v462_v11  ;;  %v382_v52 = vsel %vm1548_vm15, %v1321_v25, %v379_v14 }
  0xd8   :  { %1200 = vset.pattern.permute.xlu1 %v1260_v48  ;;  %1201 = vset.pattern.permute.xlu0 %v1260_v48  ;;  %v169_v24 = vmul.f32 %v168_v49, %v166_v37  ;;  %1209 = vcosq.f32 %v382_v52  ;;  %v276_v55 = vsub.s32 4, %v1496_v61  ;;  %v485_v43 = vsel %vm400_vm3, %v484_v18, %v1521_v50 }
  0xd9   :  { %v269_v21 = vor.u32 4788187, %v268_v60  ;;  %v272_v34 = vcvt.s32.f32 %v265_v17  ;;  %v466_v54 = vclz %v1048_v59  ;;  %669 = vperm.xlu1 %1200, %v1286_v0   ;;  %661 = vperm.xlu0 %1201, %v1298_v4   ;;  %1211 = vsinq.f32 %v382_v52 }
  0xda   :  { %v170_v22 = vxor.u32 2147483648, %v169_v24  ;;  %v381_v17 = vsel %vm296_vm13, %v380_v45, %v1401_v39  ;;  %v277_v20 = vsel %vm192_vm14, %v276_v55, %v1496_v61  ;;  %v487_v51 = vsel %vm1586_vm4, 0, %v485_v43  ;;  %v27_v55 = vld [vmem:[%s1709_s1 + $0x60] sm:$0xff] }
  0xdb   :  { %v270_v27 = vand.u32 2147483647, %v269_v21  ;;  %v1049_v40 = vadd.s32 4294967294, %v466_v54  ;;  %v172_v21 = vsub.s32 4, %v1444_v31  ;;  %v383_v41 = vsel %vm1548_vm15, 0, %v381_v17  ;;  %1129 = vmatprep.mubr.msk.f32.mxu1 %vm502_vm11, %v27_v55 }
  0xdc   :  { %v171_v8 = vsel %vm88_vm1, %v170_v22, %v169_v24  ;;  %v279_v39 = vsel %vm1560_vm0, 0, %v277_v20  ;;  %v387_v15 = vadd.s32 3, %v383_v41  ;;  %v491_v28 = vadd.s32 3, %v487_v51 }
  0xdd   :  { %v273_v1 = vmul.f32 %v272_v34, %v270_v27  ;;  %vm1050_vm12 = vcmp.lt.s32.totalorder %v1049_v40, 0  ;;  %665 = vperm.xlu1 %1200, %v1293_v3   ;;  %v173_v61 = vsel %vm88_vm1, %v172_v21, %v1444_v31  ;;  %v283_v50 = vadd.s32 3, %v279_v39 }
  0xde   :  { %v469_v29 = vsel %vm1050_vm12, 0, %v1049_v40  ;;  %v175_v34 = vsel %vm1574_vm2, 0, %v173_v61  ;;  %v388_v37 = vand.u32 3, %v387_v15  ;;  %v492_v49 = vand.u32 3, %v491_v28 }
  0xdf   :  { %v274_v62 = vxor.u32 2147483648, %v273_v1  ;;  %v470_v56 = vsub.s32 32, %v469_v29  ;;  %v474_v32 = vsub.s32 4294967266, %v469_v29  ;;  %v471_v30 = vshll.u32 %v462_v11, %v469_v29 }
  0xe0   :  { %v174_v11 = vsel %vm1574_vm2, %v1327_v33, %v171_v8  ;;  %v284_v44 = vand.u32 3, %v283_v50  ;;  %vm389_vm5 = vcmp.lt.s32.totalorder %v388_v37, 2  ;;  %vm390_vm6 = vcmp.eq.s32.totalorder %v388_v37, 0 }
  0xe1   :  { %v472_v53 = vshrl.u32 %v454_v2, %v470_v56  ;;  %v475_v57 = vadd.s32 127, %v474_v32  ;;  %v275_v6 = vsel %vm192_vm14, %v274_v62, %v273_v1  ;;  %657 = vperm.xlu1 %1200, %v1305_v5   ;;  %v179_v2 = vadd.s32 3, %v175_v34 }
  0xe2   :  { %v278_v47 = vsel %vm1560_vm0, %v1331_v36, %v275_v6  ;;  %vm393_vm7 = vcmp.eq.s32.totalorder %v388_v37, 2  ;;  %vm286_vm8 = vcmp.eq.s32.totalorder %v284_v44, 0  ;;  %vm289_vm9 = vcmp.eq.s32.totalorder %v284_v44, 2 }
  0xe3   :  { %v473_v58 = vor.u32 %v472_v53, %v471_v30  ;;  %v476_v63 = vshll.u32 %v475_v57, 23  ;;  %1213 = vcosq.f32 %v278_v47  ;;  %vm497_vm10 = vcmp.eq.s32.totalorder %v492_v49, 2 }
  0xe4   :  { %1215 = vsinq.f32 %v278_v47  ;;  %v180_v53 = vand.u32 3, %v179_v2  ;;  %vm490_vm12 = vweird.f32 %v1317_v16  ;;  %vm494_vm13 = vcmp.eq.s32.totalorder %v492_v49, 0  ;;  %v30_v2 = vld [vmem:[%s1709_s1 + $0x78] sm:$0xff] }
  0xe5   :  { %v477_v46 = vor.u32 4788187, %v476_v63  ;;  %v480_v9 = vcvt.s32.f32 %v473_v58  ;;  %1217 = vcosq.f32 %v174_v11  ;;  %v1210_v59 = vpop.eup %1209  ;;  %vm493_vm14 = vcmp.lt.s32.totalorder %v492_v49, 2  ;;  %v29_v49 = vld [vmem:[%s1709_s1 + $0x70] sm:$0xff] }
  0xe6   :  { %1219 = vsinq.f32 %v174_v11  ;;  %v1212_v27 = vpop.eup %1211  ;;  %v394_v40 = vxor.u32 2147483648, %v1210_v59  ;;  %vm386_vm15 = vweird.f32 %v1321_v25  ;;  %vm285_vm0 = vcmp.lt.s32.totalorder %v284_v44, 2  ;;  %v28_v44 = vld [vmem:[%s1709_s1 + $0x68] sm:$0xff] }
  0xe7   :  { %v478_v42 = vand.u32 2147483647, %v477_v46  ;;  %v391_v1 = vxor.u32 2147483648, %v1212_v27  ;;  %vm182_vm1 = vcmp.eq.s32.totalorder %v180_v53, 0  ;;  %vm185_vm2 = vcmp.eq.s32.totalorder %v180_v53, 2 }
  0xe8   :  { %v395_v32 = vsel %vm393_vm7, %v394_v40, %v1212_v27  ;;  %v1261_v11 = vmov 4   ;;  %v1264_v55 = vmov 0.0  }
  0xe9   :  { %v481_v10 = vmul.f32 %v480_v9, %v478_v42  ;;  %v392_v56 = vsel %vm390_vm6, %v1210_v59, %v391_v1  ;;  %1202 = vset.pattern.permute.xlu1 %v1261_v11  ;;  %1203 = vset.pattern.permute.xlu0 %v1261_v11  ;;  %vm1265_vm6 = vmmov 0   ;;  %v1266_v11 = vmov 7  }
  0xea   :  { %v396_v52 = vsel %vm389_vm5, %v392_v56, %v395_v32  ;;  %vm178_vm5 = vweird.f32 %v1327_v33  ;;  %v22_v33 = vld [vmem:[%s1709_s1 + $0x38] sm:$0xff]  ;;  %693 = vperm.xlu1 %1202, %v1286_v0   ;;  %689 = vperm.xlu0 %1203, %v1293_v3   ;;  %v1262_v56 = vmov 5   ;;  %v1225_v32 = vld [vmem:[%s1709_s1 + $0x10] sm:$0xff] }
  0xeb   :  { %v482_v60 = vxor.u32 2147483648, %v481_v10  ;;  %v397_v42 = vsel %vm386_vm15, nan, %v396_v52 }
  0xed   :  { %v483_v38 = vsel %vm400_vm3, %v482_v60, %v481_v10  ;;  %vm282_vm3 = vweird.f32 %v1331_v36  ;;  %v21_v36 = vld [vmem:[%s1709_s1 + $0x30] sm:$0xff] }
  0xee   :  { %v486_v19 = vsel %vm1586_vm4, %v1317_v16, %v483_v38  ;;  %vm181_vm4 = vcmp.lt.s32.totalorder %v180_v53, 2  ;;  %685 = vperm.xlu1 %1202, %v1298_v4   ;;  %1204 = vset.pattern.permute.xlu0 %v1262_v56  ;;  %v1263_v53 = vmov 6  }
  0xef   :  { %1221 = vcosq.f32 %v486_v19 }
  0xf0   :  { %1223 = vsinq.f32 %v486_v19  ;;  %v1214_v35 = vpop.eup %1213 }
  0xf1   :  { %v1216_v54 = vpop.eup %1215  ;;  %v290_v24 = vxor.u32 2147483648, %v1214_v35 }
  0xf2   :  { %v1218_v29 = vpop.eup %1217  ;;  %v287_v48 = vxor.u32 2147483648, %v1216_v54  ;;  %681 = vperm.xlu1 %1202, %v1305_v5  }
  0xf3   :  { %v1220_v62 = vpop.eup %1219  ;;  %v186_v57 = vxor.u32 2147483648, %v1218_v29  ;;  %v291_v6 = vsel %vm289_vm9, %v290_v24, %v1216_v54  ;;  %v31_v24 = vld [vmem:[%s1709_s1 + $0x80] sm:$0xff] }
  0xf4   :  { %v288_v22 = vsel %vm286_vm8, %v1214_v35, %v287_v48  ;;  %v183_v58 = vxor.u32 2147483648, %v1220_v62  ;;  %v24_v48 = vld [vmem:[%s1709_s1 + $0x48] sm:$0xff] }
  0xf5   :  { %v292_v47 = vsel %vm285_vm0, %v288_v22, %v291_v6  ;;  %v187_v10 = vsel %vm185_vm2, %v186_v57, %v1220_v62  ;;  %v25_v62 = vld [vmem:[%s1709_s1 + $0x50] sm:$0xff]  ;;  %v1228_v57 = vld [vmem:[%s1709_s1] sm:$0xff] }
  0xf6   :  { %v184_v9 = vsel %vm182_vm1, %v1218_v29, %v183_v58  ;;  %v293_v16 = vsel %vm282_vm3, nan, %v292_v47  ;;  %v23_v29 = vld [vmem:[%s1709_s1 + $0x40] sm:$0xff]  ;;  %1205 = vset.pattern.permute.xlu1 %v1262_v56 }
  0xf7   :  { %v188_v45 = vsel %vm181_vm4, %v184_v9, %v187_v10  ;;  %903 = vperm.xlu1 %1205, %v1225_v32  }
  0xf8   :  { %v189_v25 = vsel %vm178_vm5, nan, %v188_v45 }
  0xfc   :  { %v1222_v31 = vpop.eup %1221 }
  0xfd   :  { %v1224_v14 = vpop.eup %1223  ;;  %v498_v30 = vxor.u32 2147483648, %v1222_v31 }
  0xfe   :  { %v495_v23 = vxor.u32 2147483648, %v1224_v14 }
  0xff   :  { %v499_v63 = vsel %vm497_vm10, %v498_v30, %v1224_v14  ;;  %v1226_v14 = vld [vmem:[%s1709_s1 + $0x18] sm:$0xff]  ;;  %v1227_v30 = vld [vmem:[%s1709_s1 + $0x8] sm:$0xff] }
 0x100   :  { %v496_v46 = vsel %vm494_vm13, %v1222_v31, %v495_v23  ;;  %v26_v31 = vld [vmem:[%s1709_s1 + $0x58] sm:$0xff]  ;;  %907 = vperm.xlu0 %1204, %v1226_v14   ;;  %899 = vperm.xlu1 %1205, %v1227_v30  }
 0x101   :  { %v500_v26 = vsel %vm493_vm14, %v496_v46, %v499_v63 }
 0x102   :  { %v501_v8 = vsel %vm490_vm12, nan, %v500_v26 }
 0x103   :  { %1101 = vmatprep.subr.mxu0 %v501_v8 }
 0x104   :  { %1102 = vmatpush3.msra.mxu0 %v501_v8  ;;  %1206 = vset.pattern.permute.xlu0 %v1263_v53 }
 0x105   :  { %1103 = vmatprep.subr.mxu0 %v397_v42  ;;  %931 = vperm.xlu0 %1206, %v1226_v14  }
 0x106   :  { %1104 = vmatpush3.msra.mxu0 %v397_v42  ;;  %895 = vperm.xlu1 %1205, %v1228_v57  }
 0x107   :  { %1105 = vmatprep.subr.mxu0 %v293_v16 }
 0x108   :  { %1106 = vmatpush3.msra.mxu0 %v293_v16 }
 0x109   :  { %1107 = vmatprep.subr.mxu0 %v189_v25  ;;  %923 = vperm.xlu0 %1206, %v1227_v30  }
 0x10a   :  { %1108 = vmatpush3.msra.mxu0 %v189_v25  ;;  %1207 = vset.pattern.permute.xlu1 %v1263_v53 }
 0x10b   :  { %1110 = vmatmul.mubr.msk.f32.vlgmr.msra.gmra.mxu0 %vm502_vm11, %v20_v7  ;;  %927 = vperm.xlu1 %1207, %v1225_v32   ;;  %v32_v7 = vld [vmem:[%s1709_s1 + $0x88] sm:$0xff] }
 0x10c   :  { %1112 = vmatprep.mubr.msk.f32.mxu0 %vm502_vm11, %v21_v36  ;;  %v33_v36 = vld [vmem:[%s1709_s1 + $0x90] sm:$0xff]  ;;  %1149 = vmatprep.subr.mxu0 %v1264_v55 }
 0x10d   :  { %1208 = vset.pattern.permute.xlu0 %v1266_v11 }
 0x10e   :  { %943 = vperm.xlu0 %1208, %v1228_v57  }
 0x10f   :  { %1113 = vmatmul.mubr.msk.f32.gmra.mxu0 %vm502_vm11, %v22_v33  ;;  %919 = vperm.xlu1 %1207, %v1228_v57   ;;  %v34_v33 = vld [vmem:[%s1709_s1 + $0x98] sm:$0xff] }
 0x110   :  { %1115 = vmatprep.mubr.msk.f32.mxu0 %vm502_vm11, %v23_v29 }
 0x113   :  { %1116 = vmatmul.mubr.msk.f32.gmra.mxu0 %vm502_vm11, %v24_v48 }
 0x114   :  { %1118 = vmatprep.mubr.msk.f32.mxu0 %vm502_vm11, %v25_v62 }
 0x117   :  { %1119 = vmatmul.mubr.msk.f32.gmra.mxu0 %vm502_vm11, %v26_v31 }
 0x118   :  { %1157 = vmatprep.mubr.msk.f32.mxu0 %vm1265_vm6, %v1264_v55 }
 0x14b   :  { %v646_v60 = vpop.permute.xlu1 %645  ;;  %v642_v13 = vpop.permute.xlu0 %641 }
 0x14c   :  { %v651_v21 = vmul.f32 %v646_v60, %v1314_v12  ;;  %v650_v3 = vmul.f32 %v642_v13, %v1314_v12 }
 0x14f   :  { %v638_v18 = vpop.permute.xlu1 %637  ;;  %v634_v17 = vpop.permute.xlu0 %633 }
 0x150   :  { %v649_v41 = vmul.f32 %v638_v18, %v1314_v12  ;;  %v648_v0 = vmul.f32 %v634_v17, %v1314_v12 }
 0x154   :  { %v670_v38 = vpop.permute.xlu1 %669  ;;  %v662_v5 = vpop.permute.xlu0 %661 }
 0x158   :  { %v666_v20 = vpop.permute.xlu1 %665 }
 0x15c   :  { %v658_v27 = vpop.permute.xlu1 %657 }
 0x165   :  { %v694_v23 = vpop.permute.xlu1 %693  ;;  %v690_v52 = vpop.permute.xlu0 %689 }
 0x169   :  { %v686_v22 = vpop.permute.xlu1 %685 }
 0x16d   :  { %v682_v26 = vpop.permute.xlu1 %681 }
 0x172   :  { %v904_v60 = vpop.permute.xlu1 %903 }
 0x17b   :  { %v900_v18 = vpop.permute.xlu1 %899 }
 0x181   :  { %v896_v17 = vpop.permute.xlu1 %895 }
 0x1cb   :  { %v1111_v19 = vpop.f32.mrf.mxu0 }
 0x1cc   :  { %v653_v4 = vadd.f32 %v1111_v19, %v649_v41 }
 0x1cd   :  { %v593_v43 = vpop.f32.mrf.mxu0 }
 0x1ce   :  { %v652_v61 = vadd.f32 %v648_v0, %v593_v43  ;;  %v673_v28 = vadd.f32 %v662_v5, %v653_v4 }
 0x1cf   :  { %v1114_v39 = vpop.f32.mrf.mxu0 }
 0x1d0   :  { %v655_v51 = vadd.f32 %v1114_v39, %v651_v21  ;;  %v672_v54 = vadd.f32 %v658_v27, %v652_v61  ;;  %v677_v1 = vmax.f32 %v673_v28, 0.0  ;;  %v912_v61 = vmul.f32 %v904_v60, %v1314_v12 }
 0x1d1   :  { %v603_v15 = vpop.f32.mrf.mxu0  ;;  %v910_v27 = vmul.f32 %v896_v17, %v1314_v12 }
 0x1d2   :  { %v654_v59 = vadd.f32 %v650_v3, %v603_v15  ;;  %v675_v50 = vadd.f32 %v670_v38, %v655_v51  ;;  %v676_v40 = vmax.f32 %v672_v54, 0.0  ;;  %v908_v38 = vpop.permute.xlu0 %907  ;;  %v928_v3 = vpop.permute.xlu1 %927  ;;  %v911_v51 = vmul.f32 %v900_v18, %v1314_v12 }
 0x1d3   :  { %v1117_v13 = vpop.f32.mrf.mxu0  ;;  %v913_v0 = vmul.f32 %v908_v38, %v1314_v12  ;;  %v35_v12 = vld [vmem:[%s1709_s1 + $0xa0] sm:$0xff] }
 0x1d4   :  { %v674_v35 = vadd.f32 %v666_v20, %v654_v59  ;;  %v679_v34 = vmax.f32 %v675_v50, 0.0 }
 0x1d5   :  { %v613_v19 = vpop.f32.mrf.mxu0 }
 0x1d6   :  { %v678_v37 = vmax.f32 %v674_v35, 0.0  ;;  %1121 = vmatprep.subr.mxu1 %v679_v34  ;;  %v932_v43 = vpop.permute.xlu0 %931 }
 0x1d7   :  { %1122 = vmatpush3.msra.mxu1 %v679_v34  ;;  %v1120_v21 = vpop.f32.mrf.mxu0 }
 0x1d8   :  { %1123 = vmatprep.subr.mxu1 %v678_v37 }
 0x1d9   :  { %1124 = vmatpush3.msra.mxu1 %v678_v37  ;;  %v623_v59 = vpop.f32.mrf.mxu0 }
 0x1da   :  { %1125 = vmatprep.subr.mxu1 %v677_v1  ;;  %v924_v54 = vpop.permute.xlu0 %923 }
 0x1db   :  { %1126 = vmatpush3.msra.mxu1 %v677_v1 }
 0x1dc   :  { %1127 = vmatprep.subr.mxu1 %v676_v40 }
 0x1dd   :  { %1128 = vmatpush3.msra.mxu1 %v676_v40 }
 0x1de   :  { %1130 = vmatmul.mubr.msk.f32.vlgmr.msra.gmra.mxu1 %vm502_vm11, %v28_v44  ;;  %v920_v44 = vpop.permute.xlu1 %919  ;;  %v944_v56 = vpop.permute.xlu0 %943 }
 0x1df   :  { %1132 = vmatprep.mubr.msk.f32.mxu1 %vm502_vm11, %v29_v49 }
 0x1e2   :  { %1133 = vmatmul.mubr.msk.f32.gmra.mxu1 %vm502_vm11, %v30_v2 }
 0x1e3   :  { %1143 = vmatprep.mubr.msk.f32.mxu1 %vm502_vm11, %v31_v24 }
 0x29e   :  { %v1131_v6 = vpop.f32.mrf.mxu1 }
 0x29f   :  { %v780_v8 = vadd.f32 %v1131_v6, %v686_v22 }
 0x2a0   :  { %v774_v58 = vpop.f32.mrf.mxu1 }
 0x2a1   :  { %v775_v10 = vadd.f32 %v774_v58, %v682_v26  ;;  %v794_v45 = vmax.f32 %v780_v8, 0.0 }
 0x2a2   :  { %v1134_v63 = vpop.f32.mrf.mxu1 }
 0x2a3   :  { %v790_v46 = vadd.f32 %v1134_v63, %v694_v23  ;;  %v793_v25 = vmax.f32 %v775_v10, 0.0 }
 0x2a4   :  { %v784_v47 = vpop.f32.mrf.mxu1 }
 0x2a5   :  { %v796_v42 = vmax.f32 %v790_v46, 0.0  ;;  %v785_v9 = vadd.f32 %v784_v47, %v690_v52 }
 0x2a7   :  { %v795_v16 = vmax.f32 %v785_v9, 0.0  ;;  %1135 = vmatprep.subr.mxu1 %v796_v42 }
 0x2a8   :  { %1136 = vmatpush3.msra.mxu1 %v796_v42 }
 0x2a9   :  { %1137 = vmatprep.subr.mxu1 %v795_v16 }
 0x2aa   :  { %1138 = vmatpush3.msra.mxu1 %v795_v16 }
 0x2ab   :  { %1139 = vmatprep.subr.mxu1 %v794_v45 }
 0x2ac   :  { %1140 = vmatpush3.msra.mxu1 %v794_v45 }
 0x2ad   :  { %1141 = vmatprep.subr.mxu1 %v793_v25 }
 0x2ae   :  { %1142 = vmatpush3.msra.mxu1 %v793_v25 }
 0x2af   :  { %1144 = vmatmul.mubr.msk.f32.vlgmr.msra.gmra.mxu1 %vm502_vm11, %v32_v7 }
 0x2b0   :  { %1146 = vmatprep.mubr.msk.f32.mxu1 %vm502_vm11, %v33_v36 }
 0x2b3   :  { %1147 = vmatmul.mubr.msk.f32.gmra.mxu1 %vm502_vm11, %v34_v33 }
 0x36f   :  { %v1145_v20 = vpop.f32.mrf.mxu1 }
 0x370   :  { %v881_v39 = vadd.f32 %v1145_v20, %v1117_v13 }
 0x371   :  { %v875_v41 = vpop.f32.mrf.mxu1 }
 0x372   :  { %v876_v5 = vadd.f32 %v875_v41, %v613_v19  ;;  %v915_v28 = vadd.f32 %v911_v51, %v881_v39 }
 0x373   :  { %v1148_v4 = vpop.f32.mrf.mxu1 }
 0x374   :  { %v891_v15 = vadd.f32 %v1148_v4, %v1120_v21  ;;  %v914_v1 = vadd.f32 %v910_v27, %v876_v5  ;;  %v935_v49 = vadd.f32 %v924_v54, %v915_v28 }
 0x375   :  { %v885_v50 = vpop.f32.mrf.mxu1 }
 0x376   :  { %v917_v35 = vadd.f32 %v913_v0, %v891_v15  ;;  %v886_v34 = vadd.f32 %v885_v50, %v623_v59  ;;  %v934_v48 = vadd.f32 %v920_v44, %v914_v1  ;;  %v939_v62 = vmax.f32 %v935_v49, 0.0 }
 0x378   :  { %v937_v37 = vadd.f32 %v932_v43, %v917_v35  ;;  %v916_v40 = vadd.f32 %v912_v61, %v886_v34  ;;  %v938_v31 = vmax.f32 %v934_v48, 0.0 }
 0x37a   :  { %v941_v2 = vmax.f32 %v937_v37, 0.0  ;;  %v936_v29 = vadd.f32 %v928_v3, %v916_v40 }
 0x37c   :  { %v940_v24 = vmax.f32 %v936_v29, 0.0  ;;  %1150 = vmatpush3.msra.mxu0 %v941_v2 }
 0x37d   :  { %1151 = vmatprep.subr.mxu0 %v1264_v55 }
 0x37e   :  { %1152 = vmatpush3.msra.mxu0 %v940_v24 }
 0x37f   :  { %1153 = vmatprep.subr.mxu0 %v1264_v55 }
 0x380   :  { %1154 = vmatpush3.msra.mxu0 %v939_v62 }
 0x381   :  { %1155 = vmatprep.subr.mxu0 %v1264_v55 }
 0x382   :  { %1156 = vmatpush3.msra.mxu0 %v938_v31 }
 0x383   :  { %1158 = vmatmul.mubr.msk.f32.vlgmr.msra.gmra.mxu0 %vm502_vm11, %v35_v12 }
 0x443   :  { %v1015_v32 = vpop.f32.mrf.mxu0 }
 0x444   :  { %v1016_v14 = vadd.f32 %v1015_v32, %v944_v56 }
 0x445   :  { %v1159_v30 = vpop.f32.mrf.mxu0 }
 0x446   :  { %1019 = vst [vmem:[#allocation2] sm:$0xff] %v1016_v14 }
 0x447   :  { %1240 = shalt.err (!%p1237_p4)
}
 0x448   :  { %1029 = dma.vmem_to_hbm [thread:$0]  %s1027_s4, 128, %s1710_s2, [#allocation3]  }
 0x449   :  { %1249 = dma.done.wait [#allocation3], 128  }
 0x44a   :  { %1250 = vsyncadd [#allocation3], 4294967168 }
 0x44b   :  { %1033 = vsyncpa [#allocation3], 1 }

</bundles_post_ra>
